<compile_context>
chip_gen: v5e
topology: v5e:2x2
jax: 0.10.0
libtpu: 0.0.40
codegen_flags: <defaults>
</compile_context>

<pallas_src>
import jax
import jax.numpy as jnp
from jax.experimental import pallas as pl
from jax.experimental.pallas import tpu as pltpu


def _pooler_kernel(x_ref, w_ref, b_ref, o_ref):
    # x_ref: [tm, H_in] token-0 activations
    # w_ref: [H_in, tn]  pre-transposed weight tile (no in-kernel transpose)
    # b_ref: [1, tn]     bias tile
    y = jnp.dot(x_ref[...], w_ref[...], preferred_element_type=jnp.float32)
    y = y + b_ref[...].astype(jnp.float32)        # f32 bias-add
    o_ref[...] = jnp.tanh(y).astype(o_ref.dtype)  # EUP tanh, then cast


def _pick_col_tile(H, col_tile):
    """Lane-dense N tile that evenly divides H; falls back to full H."""
    if col_tile % 128 == 0 and H % col_tile == 0:
        return col_tile
    for c in (384, 256, 128):
        if H % c == 0:
            return c
    return H


def blip_text_pooler(hidden_states, weight, bias, *, row_tile=256, col_tile=256,
                     compute_dtype=None):
    """hidden_states: [B, S, H]; weight: [H, H] (PyTorch [out, in]); bias: [H]."""
    B, S, H = hidden_states.shape
    out_dtype = hidden_states.dtype

    # Token-0 select in the wrapper: copies only B*H elements, presents
    # contiguous lane-dense [tm, H] row blocks to the kernel.
    x = hidden_states[:, 0, :]                    # [B, H]

    # One-time weight transpose -> [H_in, H_out] so the kernel contracts
    # (x dim 1) x (w dim 0): no per-grid-step RHS transpose on the MXU path.
    w_t = jnp.transpose(weight)                   # [H_in, H_out]

    # Optional low-precision MXU path; always match weight dtype to x dtype.
    if compute_dtype is not None:
        x = x.astype(compute_dtype)
    w_t = w_t.astype(x.dtype)

    b2 = bias.reshape(1, H)

    tm = min(row_tile, B)                         # big row tiles, amortized DMA
    tn = _pick_col_tile(H, col_tile)              # N split: megacore + DMA pipelining
    grid = (pl.cdiv(B, tm), H // tn)

    out = pl.pallas_call(
        _pooler_kernel,
        out_shape=jax.ShapeDtypeStruct((B, H), out_dtype),
        grid_spec=pltpu.PrefetchScalarGridSpec(
            num_scalar_prefetch=0,
            grid=grid,
            in_specs=[
                pl.BlockSpec((tm, H), lambda i, j: (i, 0)),   # token-0 rows
                pl.BlockSpec((H, tn), lambda i, j: (0, j)),   # weight (pre-transposed) N tile
                pl.BlockSpec((1, tn), lambda i, j: (0, j)),   # bias N tile
            ],
            out_specs=pl.BlockSpec((tm, tn), lambda i, j: (i, j)),
        ),
        compiler_params=pltpu.CompilerParams(
            dimension_semantics=("parallel", "parallel")),
    )(x, w_t, b2)
    return out


def _reference(hidden_states, weight, bias):
    first = hidden_states[:, 0, :].astype(jnp.float32)
    w = weight.astype(jnp.float32)
    y = jnp.einsum("bh,oh->bo", first, w) + bias.astype(jnp.float32)
    return jnp.tanh(y)


if __name__ == "__main__":
    key = jax.random.PRNGKey(0)

    # --- Small f32 smoke test (module-consistent tiny shapes) ---------------
    B, S, H = 2, 8, 32
    k1, k2, k3, k4 = jax.random.split(key, 4)
    hidden_states = jax.random.normal(k1, (B, S, H), dtype=jnp.float32)
    weight = jax.random.normal(k2, (H, H), dtype=jnp.float32) * 0.02   # [out, in]
    bias = jax.random.normal(k3, (H,), dtype=jnp.float32) * 0.02

    out = jax.block_until_ready(blip_text_pooler(hidden_states, weight, bias))
    ref = _reference(hidden_states, weight, bias)
    assert out.shape == (B, H)
    assert jnp.allclose(out, ref.astype(out.dtype), atol=1e-5, rtol=1e-5), \
        "mismatch vs reference (f32, H=32)"

    # --- Multi-N-tile path (H=512 -> two 256-wide weight/output tiles) ------
    B2, S2, H2 = 16, 4, 512
    ka, kb, kc = jax.random.split(k4, 3)
    hs2 = jax.random.normal(ka, (B2, S2, H2), dtype=jnp.float32)
    w2 = jax.random.normal(kb, (H2, H2), dtype=jnp.float32) * 0.02
    b2 = jax.random.normal(kc, (H2,), dtype=jnp.float32) * 0.02

    out2 = jax.block_until_ready(blip_text_pooler(hs2, w2, b2))
    ref2 = _reference(hs2, w2, b2)
    assert out2.shape == (B2, H2)
    assert jnp.allclose(out2, ref2.astype(out2.dtype), atol=5e-3, rtol=5e-3), \
        "mismatch vs reference (f32, H=512, N-split)"

    # --- bf16 compute path (full-rate MXU), f32 accumulation ----------------
    out3 = jax.block_until_ready(
        blip_text_pooler(hs2, w2, b2, compute_dtype=jnp.bfloat16))
    assert out3.shape == (B2, H2)
    assert jnp.allclose(out3, ref2.astype(out3.dtype), atol=2e-2, rtol=2e-2), \
        "mismatch vs reference (bf16 compute path)"

    print("KERNEL_OK")
</pallas_src>

<mosaic_0001>
module attributes {stable_mosaic.version = 11 : i64} {
  func.func @_pooler_kernel(%arg0: i32, %arg1: i32, %arg2: memref<2x32xf32, #tpu.memory_space<vmem>>, %arg3: memref<32x32xf32, #tpu.memory_space<vmem>>, %arg4: memref<1x32xf32, #tpu.memory_space<vmem>>, %arg5: memref<2x32xf32, #tpu.memory_space<vmem>>) attributes {dimension_semantics = [#tpu.dimension_semantics<parallel>, #tpu.dimension_semantics<parallel>], iteration_bounds = array<i64: 1, 1>, scalar_prefetch = 0 : i64, scratch_operands = 0 : i64, tpu.core_type = #tpu.core_type<tc>, window_params = [{transform_indices = @transform_0, window_bounds = array<i64: 2, 32>}, {transform_indices = @transform_1, window_bounds = array<i64: 32, 32>}, {transform_indices = @transform_2, window_bounds = array<i64: 1, 32>}, {transform_indices = @transform_3, window_bounds = array<i64: 2, 32>}]} {
    %c0 = arith.constant 0 : index
    %c0_0 = arith.constant 0 : index
    %0 = vector.load %arg2[%c0, %c0_0] : memref<2x32xf32, #tpu.memory_space<vmem>>, vector<2x32xf32>
    %c0_1 = arith.constant 0 : index
    %c0_2 = arith.constant 0 : index
    %1 = vector.load %arg3[%c0_1, %c0_2] : memref<32x32xf32, #tpu.memory_space<vmem>>, vector<32x32xf32>
    %cst = arith.constant dense<0.000000e+00> : vector<2x32xf32>
    %2 = tpu.matmul %0, %1, %cst {dimension_numbers = #tpu.dot_dimension_numbers<[1], [0], [0], [1], [0, 0, 1, 1], [], []>} : vector<2x32xf32>, vector<32x32xf32>, vector<2x32xf32> -> vector<2x32xf32>
    %c0_3 = arith.constant 0 : index
    %c0_4 = arith.constant 0 : index
    %3 = vector.load %arg4[%c0_3, %c0_4] : memref<1x32xf32, #tpu.memory_space<vmem>>, vector<1x32xf32>
    %4 = vector.broadcast %3 : vector<1x32xf32> to vector<2x32xf32>
    %5 = arith.addf %2, %4 : vector<2x32xf32>
    %6 = math.tanh %5 : vector<2x32xf32>
    %c0_5 = arith.constant 0 : index
    %c0_6 = arith.constant 0 : index
    %7 = vector.load %arg5[%c0_5, %c0_6] : memref<2x32xf32, #tpu.memory_space<vmem>>, vector<2x32xf32>
    tpu.vector_store %arg5[%c0_5, %c0_6], %6 {strides = array<i32>} : memref<2x32xf32, #tpu.memory_space<vmem>>, vector<2x32xf32>,
    return
  }
  func.func @transform_0(%arg0: i32, %arg1: i32) -> (i32, i32) {
    %c0_i32 = arith.constant 0 : i32
    %c0_i32_0 = arith.constant 0 : i32
    return %arg0, %c0_i32 : i32, i32
  }
  func.func @transform_1(%arg0: i32, %arg1: i32) -> (i32, i32) {
    %c0_i32 = arith.constant 0 : i32
    %c0_i32_0 = arith.constant 0 : i32
    return %c0_i32, %arg1 : i32, i32
  }
  func.func @transform_2(%arg0: i32, %arg1: i32) -> (i32, i32) {
    %c0_i32 = arith.constant 0 : i32
    %c0_i32_0 = arith.constant 0 : i32
    return %c0_i32, %arg1 : i32, i32
  }
  func.func @transform_3(%arg0: i32, %arg1: i32) -> (i32, i32) {
    %c0_i32 = arith.constant 0 : i32
    return %arg0, %arg1 : i32, i32
  }
}

</mosaic_0001>

<bundles_post_ra>
// kernel: tpu_custom_call.1
= control target key start
LH: loop header
LB: loop body
LE: loop exit
PB: predicated region body
PF: predicated region fallthrough
CT: control target
= control target key end

     0   :  { %8 = vsyncpa [#allocation3], 0  ;;  %s223_s0 = inlined_call_operand.hbm [shape: f32[2,32], index: 0, kind: input, shape index: {}]   ;;  %s224_s1 = inlined_call_operand.hbm [shape: f32[32,32], index: 1, kind: input, shape index: {}]   ;;  %s225_s2 = inlined_call_operand.vmem [shape: f32[1,32], index: 2, kind: input, shape index: {}]   ;;  %s226_s3 = inlined_call_operand.hbm [shape: f32[2,32], index: 3, kind: output, shape index: {}]  }
   0x1   :  { %9 = vsyncpa [#allocation6], 0 }
   0x2   :  { %10 = vsyncpa [#allocation4], 0  ;;  %s16_s14 = sshll.u32 %s223_s0, 4  ;;  %s186_s15 = smov [#allocation2]   ;;  %s17_s14 = int_to_ptr.hbm [resolvable:$true] %s16_s14 }
   0x3   :  { %s18_s16 = sshll.u32 %s186_s15, 4  ;;  %s26_s19 = sshll.u32 %s224_s1, 4  ;;  %s19_s16 = int_to_ptr.vmem [resolvable:$true] %s18_s16  ;;  %s27_s19 = int_to_ptr.hbm [resolvable:$true] %s26_s19 }
   0x4   :  { %21 = dma.hbm_to_vmem [thread:$0]  %s17_s14, 32, %s19_s16, [#allocation3]  }
   0x5   :  { %s187_s20 = smov [#allocation5]   ;;  %s188_s22 = smov 128  }
   0x6   :  { %s28_s21 = sshll.u32 %s187_s20, 4  ;;  %s189_s23 = smov 8   ;;  %s29_s21 = int_to_ptr.vmem [resolvable:$true] %s28_s21 }
   0x7   :  { %34 = dma.hbm_to_vmem [thread:$0]  %s27_s19, 512, %s29_s21, [#allocation6], %s188_s22, %s188_s22, %s189_s23  }
   0x8   :  { %180 = dma.done.wait [#allocation3], 32  }
   0x9   :  { %181 = vsyncadd [#allocation3], 4294967264 }
   0xa   :  { %182 = dma.done.wait [#allocation6], 512  }
   0xb   :  { %183 = vsyncadd [#allocation6], 4294966784  ;;  %v49_v0 = vld [vmem:[#allocation5 + $0x18] sm:$0xff]  ;;  %v48_v1 = vld [vmem:[#allocation5 + $0x10] sm:$0xff]  ;;  %vm54_vm0 = vcmask 261120   ;;  %s190_s24 = smov [#allocation7]  }
   0xc   :  { %70 = vmatpush.msra.mxu0 %v49_v0  ;;  %v47_v2 = vld [vmem:[#allocation5 + $0x8] sm:$0xff]  ;;  %v46_v3 = vld [vmem:[#allocation5] sm:$0xff]  ;;  %v45_v4 = vld [vmem:[#allocation2] sm:$0x3]  ;;  %s86_s25 = sshll.u32 %s190_s24, 4  ;;  %s88_s28 = sshll.u32 %s226_s3, 4  ;;  %s87_s25 = int_to_ptr.vmem [resolvable:$true] %s86_s25  ;;  %s89_s28 = int_to_ptr.hbm [resolvable:$true] %s88_s28 }
   0xd   :  { %v105_v5 = vld [vmem:[%s225_s2] ss:$0 sm:$0xff]  ;;  %vm79_vm1 = vcmask 254976  }
   0xe   :  { %71 = vmatpush.msra.mxu0 %v48_v1 }
  0x10   :  { %72 = vmatpush.msra.mxu0 %v47_v2 }
  0x12   :  { %73 = vmatpush.msra.mxu0 %v46_v3 }
  0x13   :  { %99 = vmatmul.msk.f32.vlgmr.msra.gmra.mxu0 %vm54_vm0, %v45_v4 }
  0x90   :  { %v75_v6 = vpop.f32.mrf.mxu0 }
  0x91   :  { %v76_v7 = vadd.f32 %v105_v5, %v75_v6 }
  0x93   :  { %106 = vtanh.f32 %v76_v7 }
  0x99   :  { %v107_v8 = vpop.eup %106 }
  0x9a   :  { %80 = vst.msk [vmem:[#allocation7] sm:$0x3] %vm79_vm1, %v107_v8 }
  0x9b   :  { %91 = dma.vmem_to_hbm [thread:$0]  %s87_s25, 32, %s89_s28, [#allocation4]  }
  0x9c   :  { %184 = dma.done.wait [#allocation4], 32  }
  0x9d   :  { %185 = vsyncadd [#allocation4], 4294967264 }
  0x9e   :  { %96 = vsyncpa [#allocation3], 1 }
  0x9f   :  { %97 = vsyncpa [#allocation6], 1 }
  0xa0   :  { %98 = vsyncpa [#allocation4], 1 }

</bundles_post_ra>
